<compile_context>
chip_gen: v7x
topology: tpu7x:2x2x1
jax: 0.10.0
libtpu: 0.0.40
codegen_flags: <defaults>
</compile_context>

<pallas_src>
import functools
import math

import jax
import jax.numpy as jnp
from jax import lax
from jax.experimental import pallas as pl
from jax.experimental.pallas import tpu as pltpu


def _pair(v):
    return (v, v) if isinstance(v, int) else tuple(v)


def _make_conv_kernel(*, NB, C_in, H, W, H_out, W_out, W_padded, PH, PW,
                      tap_offsets, P):
    """Build the fused pad + im2col + GEMM + crop kernel (all sizes static)."""
    T = len(tap_offsets)

    def kernel(x_ref, w_ref, b_ref, o_ref, xpad_ref, slab_ref):
        # x_ref:    (NB, C_in, H, W)          raw input images (no host-side pad)
        # w_ref:    (C_out, T*C_in)           2-D weight matrix
        # b_ref:    (C_out, 1)
        # o_ref:    (NB, C_out, H_out*W_out)  compact lane-dense output
        # xpad_ref: (C_in, L)                 zero-padded flattened image scratch
        # slab_ref: (T*C_in, P)               fused-im2col slab scratch

        # Zero once per grid step: halo rows/cols and the tail stay zero, the
        # interior is fully overwritten below for every image.
        xpad_ref[...] = jnp.zeros_like(xpad_ref)

        for nb in range(NB):                       # static folded-batch loop
            # Fused zero-padding: scatter raw rows at row pitch W_padded.
            for h in range(H):
                start = (h + PH) * W_padded + PW
                xpad_ref[:, start:start + W] = x_ref[nb, :, h, :]

            # Fused im2col: with stride 1 each tap's window over all output
            # pixels is one contiguous slice of the flattened padded image.
            for t in range(T):
                off = tap_offsets[t]
                slab_ref[t * C_in:(t + 1) * C_in, :] = xpad_ref[:, off:off + P]

            # Single MXU GEMM over all taps + bias.
            acc = jnp.dot(w_ref[...], slab_ref[...],
                          preferred_element_type=jnp.float32) + b_ref[...]

            # In-kernel crop of junk columns [W_out, W_padded): the HBM output
            # block is already compact NC(H_out*W_out).
            for oh in range(H_out):
                src = acc[:, oh * W_padded: oh * W_padded + W_out]
                o_ref[nb, :, oh * W_out:(oh + 1) * W_out] = src.astype(o_ref.dtype)

    return kernel


@functools.partial(
    jax.jit, static_argnames=("stride", "padding", "dilation", "batch_block"))
def conv2d_pallas(x, weight, bias, *, stride=(1, 1), padding=(1, 1),
                  dilation=(1, 1), batch_block=1):
    """Equivalent to torch.nn.Conv2d(groups=1, padding_mode='zeros')(x).

    x:      (N, C_in, H, W)        float32
    weight: (C_out, C_in, KH, KW)  float32
    bias:   (C_out,)               float32
    batch_block: images per grid step (1 = megacore-parallel on v7x,
                 N = single folded step, preferred on single-TC v5e/v6e).
    returns (N, C_out, H_out, W_out)
    """
    stride = _pair(stride)
    padding = _pair(padding)
    dilation = _pair(dilation)
    SH, SW = stride
    PH, PW = padding
    DH, DW = dilation

    if (SH, SW) != (1, 1):
        # TODO(synk): stride > 1 path (module config uses stride=1); would need
        # strided pl.ds slices or a row pitch of SH*W_padded instead of the
        # contiguous-slice trick.
        raise NotImplementedError("conv2d_pallas currently supports stride=(1, 1) only")

    N, C_in, H, W = x.shape
    C_out, _, KH, KW = weight.shape

    H_out = (H + 2 * PH - DH * (KH - 1) - 1) // SH + 1
    W_out = (W + 2 * PW - DW * (KW - 1) - 1) // SW + 1
    H_pad = H + 2 * PH

    # Row pitch: make P = H_out*W_padded a multiple of 128 when the extra junk
    # columns cost at most 2x; otherwise fall back to the minimal pitch.
    # (Correct either way; only intermediate vreg layout is affected since the
    # HBM output is written compact in-kernel.)
    W_base = W + 2 * PW
    m = 128 // math.gcd(H_out, 128)
    W_aligned = ((W_base + m - 1) // m) * m
    W_padded = W_aligned if W_aligned <= 2 * W_base else W_base

    P = H_out * W_padded                          # im2col lane extent
    L = H_pad * W_padded + (KW - 1) * DW          # keeps the largest tap slice in bounds

    NB = int(batch_block)
    assert N % NB == 0, (N, NB)
    T = KH * KW

    # (C_out, C_in, KH, KW) -> (C_out, T*C_in); column order (kh*KW + kw)*C_in + ci
    # matches the slab row order built in-kernel.
    w2d = weight.transpose(0, 2, 3, 1).reshape(C_out, T * C_in)
    b_col = bias.reshape(C_out, 1)

    tap_offsets = tuple(kh * DH * W_padded + kw * DW
                        for kh in range(KH) for kw in range(KW))

    kernel = _make_conv_kernel(NB=NB, C_in=C_in, H=H, W=W, H_out=H_out,
                               W_out=W_out, W_padded=W_padded, PH=PH, PW=PW,
                               tap_offsets=tap_offsets, P=P)

    out = pl.pallas_call(
        kernel,
        out_shape=jax.ShapeDtypeStruct((N, C_out, H_out * W_out), x.dtype),
        grid_spec=pltpu.PrefetchScalarGridSpec(
            num_scalar_prefetch=0,
            grid=(N // NB,),
            in_specs=[
                pl.BlockSpec((NB, C_in, H, W), lambda n: (n, 0, 0, 0)),
                pl.BlockSpec((C_out, T * C_in), lambda n: (0, 0)),
                pl.BlockSpec((C_out, 1), lambda n: (0, 0)),
            ],
            out_specs=pl.BlockSpec((NB, C_out, H_out * W_out),
                                   lambda n: (n, 0, 0)),
            scratch_shapes=[
                pltpu.VMEM((C_in, L), jnp.float32),       # zero-padded image
                pltpu.VMEM((T * C_in, P), jnp.float32),   # im2col slab
            ],
        ),
        compiler_params=pltpu.CompilerParams(
            dimension_semantics=("parallel",)),
    )(x, w2d, b_col)

    # Contiguous (free) reshape only; the crop already happened in-kernel.
    return out.reshape(N, C_out, H_out, W_out)


if __name__ == "__main__":
    # Module config: in_channels=4, out_channels=8, kernel_size=3,
    # stride=1, padding=1, dilation=1, groups=1, bias=True, float32.
    N, C_in, H, W = 2, 4, 16, 16
    C_out, KH, KW = 8, 3, 3

    key = jax.random.PRNGKey(0)
    kx, kw_, kb = jax.random.split(key, 3)

    x = jax.random.normal(kx, (N, C_in, H, W), dtype=jnp.float32)
    # Deterministic "kaiming-uniform-like" init (synthetic; not a checkpoint load).
    fan_in = C_in * KH * KW
    bound = 1.0 / (fan_in ** 0.5)
    weight = jax.random.uniform(kw_, (C_out, C_in, KH, KW),
                                minval=-bound, maxval=bound, dtype=jnp.float32)
    bias = jax.random.uniform(kb, (C_out,), minval=-bound, maxval=bound,
                              dtype=jnp.float32)

    # Reference: XLA's native convolution.
    ref = lax.conv_general_dilated(
        x, weight, window_strides=(1, 1), padding=((1, 1), (1, 1)),
        rhs_dilation=(1, 1),
        dimension_numbers=("NCHW", "OIHW", "NCHW"),
    ) + bias.reshape(1, C_out, 1, 1)

    # Default: one image per grid step (megacore-parallel split on v7x).
    out = conv2d_pallas(x, weight, bias, stride=(1, 1), padding=(1, 1),
                        dilation=(1, 1), batch_block=1)
    out = jax.block_until_ready(out)
    assert out.shape == (N, C_out, H, W), out.shape
    assert jnp.allclose(out, ref, atol=1e-4, rtol=1e-4)

    # Folded-batch variant: single grid step (preferred on single-TC v5e/v6e).
    out_folded = conv2d_pallas(x, weight, bias, stride=(1, 1), padding=(1, 1),
                               dilation=(1, 1), batch_block=N)
    out_folded = jax.block_until_ready(out_folded)
    assert jnp.allclose(out_folded, ref, atol=1e-4, rtol=1e-4)

    print("KERNEL_OK")
</pallas_src>

<mosaic_0001>
module attributes {stable_mosaic.version = 11 : i64} {
  func.func @kernel(%arg0: i32, %arg1: memref<1x4x16x16xf32, #tpu.memory_space<vmem>>, %arg2: memref<8x36xf32, #tpu.memory_space<vmem>>, %arg3: memref<8x1xf32, #tpu.memory_space<vmem>>, %arg4: memref<1x8x256xf32, #tpu.memory_space<vmem>>, %arg5: memref<4x434xf32, #tpu.memory_space<vmem>>, %arg6: memref<36x384xf32, #tpu.memory_space<vmem>>) attributes {dimension_semantics = [#tpu.dimension_semantics<parallel>], iteration_bounds = array<i64: 2>, scalar_prefetch = 0 : i64, scratch_operands = 2 : i64, tpu.core_type = #tpu.core_type<tc>, window_params = [{transform_indices = @transform_0, window_bounds = array<i64: 1, 4, 16, 16>}, {pipeline_mode = #tpu.pipeline_mode<synchronous>, transform_indices = @transform_1, window_bounds = array<i64: 8, 36>}, {pipeline_mode = #tpu.pipeline_mode<synchronous>, transform_indices = @transform_2, window_bounds = array<i64: 8, 1>}, {transform_indices = @transform_3, window_bounds = array<i64: 1, 8, 256>}]} {
    %cst = arith.constant 0.000000e+00 : f32
    %0 = vector.broadcast %cst : f32 to vector<4x434xf32>
    %c0 = arith.constant 0 : index
    %c0_0 = arith.constant 0 : index
    %1 = vector.load %arg5[%c0, %c0_0] : memref<4x434xf32, #tpu.memory_space<vmem>>, vector<4x434xf32>
    tpu.vector_store %arg5[%c0, %c0_0], %0 {strides = array<i32>} : memref<4x434xf32, #tpu.memory_space<vmem>>, vector<4x434xf32>,
    %c0_1 = arith.constant 0 : index
    %c0_2 = arith.constant 0 : index
    %c0_3 = arith.constant 0 : index
    %c0_4 = arith.constant 0 : index
    %2 = vector.load %arg1[%c0_1, %c0_2, %c0_3, %c0_4] : memref<1x4x16x16xf32, #tpu.memory_space<vmem>>, vector<1x4x1x16xf32>
    %3 = vector.shape_cast %2 : vector<1x4x1x16xf32> to vector<4x16xf32>
    %c0_5 = arith.constant 0 : index
    %c25 = arith.constant 25 : index
    %4 = vector.load %arg5[%c0_5, %c25] : memref<4x434xf32, #tpu.memory_space<vmem>>, vector<4x16xf32>
    tpu.vector_store %arg5[%c0_5, %c25], %3 {strides = array<i32>} : memref<4x434xf32, #tpu.memory_space<vmem>>, vector<4x16xf32>,
    %c0_6 = arith.constant 0 : index
    %c0_7 = arith.constant 0 : index
    %c1 = arith.constant 1 : index
    %c0_8 = arith.constant 0 : index
    %5 = vector.load %arg1[%c0_6, %c0_7, %c1, %c0_8] : memref<1x4x16x16xf32, #tpu.memory_space<vmem>>, vector<1x4x1x16xf32>
    %6 = vector.shape_cast %5 : vector<1x4x1x16xf32> to vector<4x16xf32>
    %c0_9 = arith.constant 0 : index
    %c49 = arith.constant 49 : index
    %7 = vector.load %arg5[%c0_9, %c49] : memref<4x434xf32, #tpu.memory_space<vmem>>, vector<4x16xf32>
    tpu.vector_store %arg5[%c0_9, %c49], %6 {strides = array<i32>} : memref<4x434xf32, #tpu.memory_space<vmem>>, vector<4x16xf32>,
    %c0_10 = arith.constant 0 : index
    %c0_11 = arith.constant 0 : index
    %c2 = arith.constant 2 : index
    %c0_12 = arith.constant 0 : index
    %8 = vector.load %arg1[%c0_10, %c0_11, %c2, %c0_12] : memref<1x4x16x16xf32, #tpu.memory_space<vmem>>, vector<1x4x1x16xf32>
    %9 = vector.shape_cast %8 : vector<1x4x1x16xf32> to vector<4x16xf32>
    %c0_13 = arith.constant 0 : index
    %c73 = arith.constant 73 : index
    %10 = vector.load %arg5[%c0_13, %c73] : memref<4x434xf32, #tpu.memory_space<vmem>>, vector<4x16xf32>
    tpu.vector_store %arg5[%c0_13, %c73], %9 {strides = array<i32>} : memref<4x434xf32, #tpu.memory_space<vmem>>, vector<4x16xf32>,
    %c0_14 = arith.constant 0 : index
    %c0_15 = arith.constant 0 : index
    %c3 = arith.constant 3 : index
    %c0_16 = arith.constant 0 : index
    %11 = vector.load %arg1[%c0_14, %c0_15, %c3, %c0_16] : memref<1x4x16x16xf32, #tpu.memory_space<vmem>>, vector<1x4x1x16xf32>
    %12 = vector.shape_cast %11 : vector<1x4x1x16xf32> to vector<4x16xf32>
    %c0_17 = arith.constant 0 : index
    %c97 = arith.constant 97 : index
    %13 = vector.load %arg5[%c0_17, %c97] : memref<4x434xf32, #tpu.memory_space<vmem>>, vector<4x16xf32>
    tpu.vector_store %arg5[%c0_17, %c97], %12 {strides = array<i32>} : memref<4x434xf32, #tpu.memory_space<vmem>>, vector<4x16xf32>,
    %c0_18 = arith.constant 0 : index
    %c0_19 = arith.constant 0 : index
    %c4 = arith.constant 4 : index
    %c0_20 = arith.constant 0 : index
    %14 = vector.load %arg1[%c0_18, %c0_19, %c4, %c0_20] : memref<1x4x16x16xf32, #tpu.memory_space<vmem>>, vector<1x4x1x16xf32>
    %15 = vector.shape_cast %14 : vector<1x4x1x16xf32> to vector<4x16xf32>
    %c0_21 = arith.constant 0 : index
    %c121 = arith.constant 121 : index
    %16 = vector.load %arg5[%c0_21, %c121] : memref<4x434xf32, #tpu.memory_space<vmem>>, vector<4x16xf32>
    tpu.vector_store %arg5[%c0_21, %c121], %15 {strides = array<i32>} : memref<4x434xf32, #tpu.memory_space<vmem>>, vector<4x16xf32>,
    %c0_22 = arith.constant 0 : index
    %c0_23 = arith.constant 0 : index
    %c5 = arith.constant 5 : index
    %c0_24 = arith.constant 0 : index
    %17 = vector.load %arg1[%c0_22, %c0_23, %c5, %c0_24] : memref<1x4x16x16xf32, #tpu.memory_space<vmem>>, vector<1x4x1x16xf32>
    %18 = vector.shape_cast %17 : vector<1x4x1x16xf32> to vector<4x16xf32>
    %c0_25 = arith.constant 0 : index
    %c145 = arith.constant 145 : index
    %19 = vector.load %arg5[%c0_25, %c145] : memref<4x434xf32, #tpu.memory_space<vmem>>, vector<4x16xf32>
    tpu.vector_store %arg5[%c0_25, %c145], %18 {strides = array<i32>} : memref<4x434xf32, #tpu.memory_space<vmem>>, vector<4x16xf32>,
    %c0_26 = arith.constant 0 : index
    %c0_27 = arith.constant 0 : index
    %c6 = arith.constant 6 : index
    %c0_28 = arith.constant 0 : index
    %20 = vector.load %arg1[%c0_26, %c0_27, %c6, %c0_28] : memref<1x4x16x16xf32, #tpu.memory_space<vmem>>, vector<1x4x1x16xf32>
    %21 = vector.shape_cast %20 : vector<1x4x1x16xf32> to vector<4x16xf32>
    %c0_29 = arith.constant 0 : index
    %c169 = arith.constant 169 : index
    %22 = vector.load %arg5[%c0_29, %c169] : memref<4x434xf32, #tpu.memory_space<vmem>>, vector<4x16xf32>
    tpu.vector_store %arg5[%c0_29, %c169], %21 {strides = array<i32>} : memref<4x434xf32, #tpu.memory_space<vmem>>, vector<4x16xf32>,
    %c0_30 = arith.constant 0 : index
    %c0_31 = arith.constant 0 : index
    %c7 = arith.constant 7 : index
    %c0_32 = arith.constant 0 : index
    %23 = vector.load %arg1[%c0_30, %c0_31, %c7, %c0_32] : memref<1x4x16x16xf32, #tpu.memory_space<vmem>>, vector<1x4x1x16xf32>
    %24 = vector.shape_cast %23 : vector<1x4x1x16xf32> to vector<4x16xf32>
    %c0_33 = arith.constant 0 : index
    %c193 = arith.constant 193 : index
    %25 = vector.load %arg5[%c0_33, %c193] : memref<4x434xf32, #tpu.memory_space<vmem>>, vector<4x16xf32>
    tpu.vector_store %arg5[%c0_33, %c193], %24 {strides = array<i32>} : memref<4x434xf32, #tpu.memory_space<vmem>>, vector<4x16xf32>,
    %c0_34 = arith.constant 0 : index
    %c0_35 = arith.constant 0 : index
    %c8 = arith.constant 8 : index
    %c0_36 = arith.constant 0 : index
    %26 = vector.load %arg1[%c0_34, %c0_35, %c8, %c0_36] : memref<1x4x16x16xf32, #tpu.memory_space<vmem>>, vector<1x4x1x16xf32>
    %27 = vector.shape_cast %26 : vector<1x4x1x16xf32> to vector<4x16xf32>
    %c0_37 = arith.constant 0 : index
    %c217 = arith.constant 217 : index
    %28 = vector.load %arg5[%c0_37, %c217] : memref<4x434xf32, #tpu.memory_space<vmem>>, vector<4x16xf32>
    tpu.vector_store %arg5[%c0_37, %c217], %27 {strides = array<i32>} : memref<4x434xf32, #tpu.memory_space<vmem>>, vector<4x16xf32>,
    %c0_38 = arith.constant 0 : index
    %c0_39 = arith.constant 0 : index
    %c9 = arith.constant 9 : index
    %c0_40 = arith.constant 0 : index
    %29 = vector.load %arg1[%c0_38, %c0_39, %c9, %c0_40] : memref<1x4x16x16xf32, #tpu.memory_space<vmem>>, vector<1x4x1x16xf32>
    %30 = vector.shape_cast %29 : vector<1x4x1x16xf32> to vector<4x16xf32>
    %c0_41 = arith.constant 0 : index
    %c241 = arith.constant 241 : index
    %31 = vector.load %arg5[%c0_41, %c241] : memref<4x434xf32, #tpu.memory_space<vmem>>, vector<4x16xf32>
    tpu.vector_store %arg5[%c0_41, %c241], %30 {strides = array<i32>} : memref<4x434xf32, #tpu.memory_space<vmem>>, vector<4x16xf32>,
    %c0_42 = arith.constant 0 : index
    %c0_43 = arith.constant 0 : index
    %c10 = arith.constant 10 : index
    %c0_44 = arith.constant 0 : index
    %32 = vector.load %arg1[%c0_42, %c0_43, %c10, %c0_44] : memref<1x4x16x16xf32, #tpu.memory_space<vmem>>, vector<1x4x1x16xf32>
    %33 = vector.shape_cast %32 : vector<1x4x1x16xf32> to vector<4x16xf32>
    %c0_45 = arith.constant 0 : index
    %c265 = arith.constant 265 : index
    %34 = vector.load %arg5[%c0_45, %c265] : memref<4x434xf32, #tpu.memory_space<vmem>>, vector<4x16xf32>
    tpu.vector_store %arg5[%c0_45, %c265], %33 {strides = array<i32>} : memref<4x434xf32, #tpu.memory_space<vmem>>, vector<4x16xf32>,
    %c0_46 = arith.constant 0 : index
    %c0_47 = arith.constant 0 : index
    %c11 = arith.constant 11 : index
    %c0_48 = arith.constant 0 : index
    %35 = vector.load %arg1[%c0_46, %c0_47, %c11, %c0_48] : memref<1x4x16x16xf32, #tpu.memory_space<vmem>>, vector<1x4x1x16xf32>
    %36 = vector.shape_cast %35 : vector<1x4x1x16xf32> to vector<4x16xf32>
    %c0_49 = arith.constant 0 : index
    %c289 = arith.constant 289 : index
    %37 = vector.load %arg5[%c0_49, %c289] : memref<4x434xf32, #tpu.memory_space<vmem>>, vector<4x16xf32>
    tpu.vector_store %arg5[%c0_49, %c289], %36 {strides = array<i32>} : memref<4x434xf32, #tpu.memory_space<vmem>>, vector<4x16xf32>,
    %c0_50 = arith.constant 0 : index
    %c0_51 = arith.constant 0 : index
    %c12 = arith.constant 12 : index
    %c0_52 = arith.constant 0 : index
    %38 = vector.load %arg1[%c0_50, %c0_51, %c12, %c0_52] : memref<1x4x16x16xf32, #tpu.memory_space<vmem>>, vector<1x4x1x16xf32>
    %39 = vector.shape_cast %38 : vector<1x4x1x16xf32> to vector<4x16xf32>
    %c0_53 = arith.constant 0 : index
    %c313 = arith.constant 313 : index
    %40 = vector.load %arg5[%c0_53, %c313] : memref<4x434xf32, #tpu.memory_space<vmem>>, vector<4x16xf32>
    tpu.vector_store %arg5[%c0_53, %c313], %39 {strides = array<i32>} : memref<4x434xf32, #tpu.memory_space<vmem>>, vector<4x16xf32>,
    %c0_54 = arith.constant 0 : index
    %c0_55 = arith.constant 0 : index
    %c13 = arith.constant 13 : index
    %c0_56 = arith.constant 0 : index
    %41 = vector.load %arg1[%c0_54, %c0_55, %c13, %c0_56] : memref<1x4x16x16xf32, #tpu.memory_space<vmem>>, vector<1x4x1x16xf32>
    %42 = vector.shape_cast %41 : vector<1x4x1x16xf32> to vector<4x16xf32>
    %c0_57 = arith.constant 0 : index
    %c337 = arith.constant 337 : index
    %43 = vector.load %arg5[%c0_57, %c337] : memref<4x434xf32, #tpu.memory_space<vmem>>, vector<4x16xf32>
    tpu.vector_store %arg5[%c0_57, %c337], %42 {strides = array<i32>} : memref<4x434xf32, #tpu.memory_space<vmem>>, vector<4x16xf32>,
    %c0_58 = arith.constant 0 : index
    %c0_59 = arith.constant 0 : index
    %c14 = arith.constant 14 : index
    %c0_60 = arith.constant 0 : index
    %44 = vector.load %arg1[%c0_58, %c0_59, %c14, %c0_60] : memref<1x4x16x16xf32, #tpu.memory_space<vmem>>, vector<1x4x1x16xf32>
    %45 = vector.shape_cast %44 : vector<1x4x1x16xf32> to vector<4x16xf32>
    %c0_61 = arith.constant 0 : index
    %c361 = arith.constant 361 : index
    %46 = vector.load %arg5[%c0_61, %c361] : memref<4x434xf32, #tpu.memory_space<vmem>>, vector<4x16xf32>
    tpu.vector_store %arg5[%c0_61, %c361], %45 {strides = array<i32>} : memref<4x434xf32, #tpu.memory_space<vmem>>, vector<4x16xf32>,
    %c0_62 = arith.constant 0 : index
    %c0_63 = arith.constant 0 : index
    %c15 = arith.constant 15 : index
    %c0_64 = arith.constant 0 : index
    %47 = vector.load %arg1[%c0_62, %c0_63, %c15, %c0_64] : memref<1x4x16x16xf32, #tpu.memory_space<vmem>>, vector<1x4x1x16xf32>
    %48 = vector.shape_cast %47 : vector<1x4x1x16xf32> to vector<4x16xf32>
    %c0_65 = arith.constant 0 : index
    %c385 = arith.constant 385 : index
    %49 = vector.load %arg5[%c0_65, %c385] : memref<4x434xf32, #tpu.memory_space<vmem>>, vector<4x16xf32>
    tpu.vector_store %arg5[%c0_65, %c385], %48 {strides = array<i32>} : memref<4x434xf32, #tpu.memory_space<vmem>>, vector<4x16xf32>,
    %c0_66 = arith.constant 0 : index
    %c0_67 = arith.constant 0 : index
    %50 = vector.load %arg5[%c0_66, %c0_67] : memref<4x434xf32, #tpu.memory_space<vmem>>, vector<4x384xf32>
    %c0_68 = arith.constant 0 : index
    %c0_69 = arith.constant 0 : index
    %51 = vector.load %arg6[%c0_68, %c0_69] : memref<36x384xf32, #tpu.memory_space<vmem>>, vector<4x384xf32>
    tpu.vector_store %arg6[%c0_68, %c0_69], %50 {strides = array<i32>} : memref<36x384xf32, #tpu.memory_space<vmem>>, vector<4x384xf32>,
    %c0_70 = arith.constant 0 : index
    %c1_71 = arith.constant 1 : index
    %52 = vector.load %arg5[%c0_70, %c1_71] : memref<4x434xf32, #tpu.memory_space<vmem>>, vector<4x384xf32>
    %c4_72 = arith.constant 4 : index
    %c0_73 = arith.constant 0 : index
    %53 = vector.load %arg6[%c4_72, %c0_73] : memref<36x384xf32, #tpu.memory_space<vmem>>, vector<4x384xf32>
    tpu.vector_store %arg6[%c4_72, %c0_73], %52 {strides = array<i32>} : memref<36x384xf32, #tpu.memory_space<vmem>>, vector<4x384xf32>,
    %c0_74 = arith.constant 0 : index
    %c2_75 = arith.constant 2 : index
    %54 = vector.load %arg5[%c0_74, %c2_75] : memref<4x434xf32, #tpu.memory_space<vmem>>, vector<4x384xf32>
    %c8_76 = arith.constant 8 : index
    %c0_77 = arith.constant 0 : index
    %55 = vector.load %arg6[%c8_76, %c0_77] : memref<36x384xf32, #tpu.memory_space<vmem>>, vector<4x384xf32>
    tpu.vector_store %arg6[%c8_76, %c0_77], %54 {strides = array<i32>} : memref<36x384xf32, #tpu.memory_space<vmem>>, vector<4x384xf32>,
    %c0_78 = arith.constant 0 : index
    %c24 = arith.constant 24 : index
    %56 = vector.load %arg5[%c0_78, %c24] : memref<4x434xf32, #tpu.memory_space<vmem>>, vector<4x384xf32>
    %c12_79 = arith.constant 12 : index
    %c0_80 = arith.constant 0 : index
    %57 = vector.load %arg6[%c12_79, %c0_80] : memref<36x384xf32, #tpu.memory_space<vmem>>, vector<4x384xf32>
    tpu.vector_store %arg6[%c12_79, %c0_80], %56 {strides = array<i32>} : memref<36x384xf32, #tpu.memory_space<vmem>>, vector<4x384xf32>,
    %c0_81 = arith.constant 0 : index
    %c25_82 = arith.constant 25 : index
    %58 = vector.load %arg5[%c0_81, %c25_82] : memref<4x434xf32, #tpu.memory_space<vmem>>, vector<4x384xf32>
    %c16 = arith.constant 16 : index
    %c0_83 = arith.constant 0 : index
    %59 = vector.load %arg6[%c16, %c0_83] : memref<36x384xf32, #tpu.memory_space<vmem>>, vector<4x384xf32>
    tpu.vector_store %arg6[%c16, %c0_83], %58 {strides = array<i32>} : memref<36x384xf32, #tpu.memory_space<vmem>>, vector<4x384xf32>,
    %c0_84 = arith.constant 0 : index
    %c26 = arith.constant 26 : index
    %60 = vector.load %arg5[%c0_84, %c26] : memref<4x434xf32, #tpu.memory_space<vmem>>, vector<4x384xf32>
    %c20 = arith.constant 20 : index
    %c0_85 = arith.constant 0 : index
    %61 = vector.load %arg6[%c20, %c0_85] : memref<36x384xf32, #tpu.memory_space<vmem>>, vector<4x384xf32>
    tpu.vector_store %arg6[%c20, %c0_85], %60 {strides = array<i32>} : memref<36x384xf32, #tpu.memory_space<vmem>>, vector<4x384xf32>,
    %c0_86 = arith.constant 0 : index
    %c48 = arith.constant 48 : index
    %62 = vector.load %arg5[%c0_86, %c48] : memref<4x434xf32, #tpu.memory_space<vmem>>, vector<4x384xf32>
    %c24_87 = arith.constant 24 : index
    %c0_88 = arith.constant 0 : index
    %63 = vector.load %arg6[%c24_87, %c0_88] : memref<36x384xf32, #tpu.memory_space<vmem>>, vector<4x384xf32>
    tpu.vector_store %arg6[%c24_87, %c0_88], %62 {strides = array<i32>} : memref<36x384xf32, #tpu.memory_space<vmem>>, vector<4x384xf32>,
    %c0_89 = arith.constant 0 : index
    %c49_90 = arith.constant 49 : index
    %64 = vector.load %arg5[%c0_89, %c49_90] : memref<4x434xf32, #tpu.memory_space<vmem>>, vector<4x384xf32>
    %c28 = arith.constant 28 : index
    %c0_91 = arith.constant 0 : index
    %65 = vector.load %arg6[%c28, %c0_91] : memref<36x384xf32, #tpu.memory_space<vmem>>, vector<4x384xf32>
    tpu.vector_store %arg6[%c28, %c0_91], %64 {strides = array<i32>} : memref<36x384xf32, #tpu.memory_space<vmem>>, vector<4x384xf32>,
    %c0_92 = arith.constant 0 : index
    %c50 = arith.constant 50 : index
    %66 = vector.load %arg5[%c0_92, %c50] : memref<4x434xf32, #tpu.memory_space<vmem>>, vector<4x384xf32>
    %c32 = arith.constant 32 : index
    %c0_93 = arith.constant 0 : index
    %67 = vector.load %arg6[%c32, %c0_93] : memref<36x384xf32, #tpu.memory_space<vmem>>, vector<4x384xf32>
    tpu.vector_store %arg6[%c32, %c0_93], %66 {strides = array<i32>} : memref<36x384xf32, #tpu.memory_space<vmem>>, vector<4x384xf32>,
    %c0_94 = arith.constant 0 : index
    %c0_95 = arith.constant 0 : index
    %68 = vector.load %arg2[%c0_94, %c0_95] : memref<8x36xf32, #tpu.memory_space<vmem>>, vector<8x36xf32>
    %c0_96 = arith.constant 0 : index
    %c0_97 = arith.constant 0 : index
    %69 = vector.load %arg6[%c0_96, %c0_97] : memref<36x384xf32, #tpu.memory_space<vmem>>, vector<36x384xf32>
    %cst_98 = arith.constant dense<0.000000e+00> : vector<8x384xf32>
    %70 = tpu.matmul %68, %69, %cst_98 {dimension_numbers = #tpu.dot_dimension_numbers<[1], [0], [0], [1], [0, 0, 1, 1], [], []>} : vector<8x36xf32>, vector<36x384xf32>, vector<8x384xf32> -> vector<8x384xf32>
    %c0_99 = arith.constant 0 : index
    %c0_100 = arith.constant 0 : index
    %71 = vector.load %arg3[%c0_99, %c0_100] : memref<8x1xf32, #tpu.memory_space<vmem>>, vector<8x1xf32>
    %72 = vector.broadcast %71 : vector<8x1xf32> to vector<8x384xf32>
    %73 = arith.addf %70, %72 : vector<8x384xf32>
    %74 = vector.extract_strided_slice %73 {offsets = [0, 0], sizes = [8, 16], strides = [1, 1]} : vector<8x384xf32> to vector<8x16xf32>
    %c0_101 = arith.constant 0 : index
    %c0_102 = arith.constant 0 : index
    %c0_103 = arith.constant 0 : index
    %75 = vector.load %arg4[%c0_101, %c0_102, %c0_103] : memref<1x8x256xf32, #tpu.memory_space<vmem>>, vector<1x8x16xf32>
    %76 = vector.shape_cast %75 : vector<1x8x16xf32> to vector<8x16xf32>
    %77 = vector.shape_cast %74 : vector<8x16xf32> to vector<1x8x16xf32>
    tpu.vector_store %arg4[%c0_101, %c0_102, %c0_103], %77 {strides = array<i32>} : memref<1x8x256xf32, #tpu.memory_space<vmem>>, vector<1x8x16xf32>,
    %78 = vector.extract_strided_slice %73 {offsets = [0, 24], sizes = [8, 16], strides = [1, 1]} : vector<8x384xf32> to vector<8x16xf32>
    %c0_104 = arith.constant 0 : index
    %c0_105 = arith.constant 0 : index
    %c16_106 = arith.constant 16 : index
    %79 = vector.load %arg4[%c0_104, %c0_105, %c16_106] : memref<1x8x256xf32, #tpu.memory_space<vmem>>, vector<1x8x16xf32>
    %80 = vector.shape_cast %79 : vector<1x8x16xf32> to vector<8x16xf32>
    %81 = vector.shape_cast %78 : vector<8x16xf32> to vector<1x8x16xf32>
    tpu.vector_store %arg4[%c0_104, %c0_105, %c16_106], %81 {strides = array<i32>} : memref<1x8x256xf32, #tpu.memory_space<vmem>>, vector<1x8x16xf32>,
    %82 = vector.extract_strided_slice %73 {offsets = [0, 48], sizes = [8, 16], strides = [1, 1]} : vector<8x384xf32> to vector<8x16xf32>
    %c0_107 = arith.constant 0 : index
    %c0_108 = arith.constant 0 : index
    %c32_109 = arith.constant 32 : index
    %83 = vector.load %arg4[%c0_107, %c0_108, %c32_109] : memref<1x8x256xf32, #tpu.memory_space<vmem>>, vector<1x8x16xf32>
    %84 = vector.shape_cast %83 : vector<1x8x16xf32> to vector<8x16xf32>
    %85 = vector.shape_cast %82 : vector<8x16xf32> to vector<1x8x16xf32>
    tpu.vector_store %arg4[%c0_107, %c0_108, %c32_109], %85 {strides = array<i32>} : memref<1x8x256xf32, #tpu.memory_space<vmem>>, vector<1x8x16xf32>,
    %86 = vector.extract_strided_slice %73 {offsets = [0, 72], sizes = [8, 16], strides = [1, 1]} : vector<8x384xf32> to vector<8x16xf32>
    %c0_110 = arith.constant 0 : index
    %c0_111 = arith.constant 0 : index
    %c48_112 = arith.constant 48 : index
    %87 = vector.load %arg4[%c0_110, %c0_111, %c48_112] : memref<1x8x256xf32, #tpu.memory_space<vmem>>, vector<1x8x16xf32>
    %88 = vector.shape_cast %87 : vector<1x8x16xf32> to vector<8x16xf32>
    %89 = vector.shape_cast %86 : vector<8x16xf32> to vector<1x8x16xf32>
    tpu.vector_store %arg4[%c0_110, %c0_111, %c48_112], %89 {strides = array<i32>} : memref<1x8x256xf32, #tpu.memory_space<vmem>>, vector<1x8x16xf32>,
    %90 = vector.extract_strided_slice %73 {offsets = [0, 96], sizes = [8, 16], strides = [1, 1]} : vector<8x384xf32> to vector<8x16xf32>
    %c0_113 = arith.constant 0 : index
    %c0_114 = arith.constant 0 : index
    %c64 = arith.constant 64 : index
    %91 = vector.load %arg4[%c0_113, %c0_114, %c64] : memref<1x8x256xf32, #tpu.memory_space<vmem>>, vector<1x8x16xf32>
    %92 = vector.shape_cast %91 : vector<1x8x16xf32> to vector<8x16xf32>
    %93 = vector.shape_cast %90 : vector<8x16xf32> to vector<1x8x16xf32>
    tpu.vector_store %arg4[%c0_113, %c0_114, %c64], %93 {strides = array<i32>} : memref<1x8x256xf32, #tpu.memory_space<vmem>>, vector<1x8x16xf32>,
    %94 = vector.extract_strided_slice %73 {offsets = [0, 120], sizes = [8, 16], strides = [1, 1]} : vector<8x384xf32> to vector<8x16xf32>
    %c0_115 = arith.constant 0 : index
    %c0_116 = arith.constant 0 : index
    %c80 = arith.constant 80 : index
    %95 = vector.load %arg4[%c0_115, %c0_116, %c80] : memref<1x8x256xf32, #tpu.memory_space<vmem>>, vector<1x8x16xf32>
    %96 = vector.shape_cast %95 : vector<1x8x16xf32> to vector<8x16xf32>
    %97 = vector.shape_cast %94 : vector<8x16xf32> to vector<1x8x16xf32>
    tpu.vector_store %arg4[%c0_115, %c0_116, %c80], %97 {strides = array<i32>} : memref<1x8x256xf32, #tpu.memory_space<vmem>>, vector<1x8x16xf32>,
    %98 = vector.extract_strided_slice %73 {offsets = [0, 144], sizes = [8, 16], strides = [1, 1]} : vector<8x384xf32> to vector<8x16xf32>
    %c0_117 = arith.constant 0 : index
    %c0_118 = arith.constant 0 : index
    %c96 = arith.constant 96 : index
    %99 = vector.load %arg4[%c0_117, %c0_118, %c96] : memref<1x8x256xf32, #tpu.memory_space<vmem>>, vector<1x8x16xf32>
    %100 = vector.shape_cast %99 : vector<1x8x16xf32> to vector<8x16xf32>
    %101 = vector.shape_cast %98 : vector<8x16xf32> to vector<1x8x16xf32>
    tpu.vector_store %arg4[%c0_117, %c0_118, %c96], %101 {strides = array<i32>} : memref<1x8x256xf32, #tpu.memory_space<vmem>>, vector<1x8x16xf32>,
    %102 = vector.extract_strided_slice %73 {offsets = [0, 168], sizes = [8, 16], strides = [1, 1]} : vector<8x384xf32> to vector<8x16xf32>
    %c0_119 = arith.constant 0 : index
    %c0_120 = arith.constant 0 : index
    %c112 = arith.constant 112 : index
    %103 = vector.load %arg4[%c0_119, %c0_120, %c112] : memref<1x8x256xf32, #tpu.memory_space<vmem>>, vector<1x8x16xf32>
    %104 = vector.shape_cast %103 : vector<1x8x16xf32> to vector<8x16xf32>
    %105 = vector.shape_cast %102 : vector<8x16xf32> to vector<1x8x16xf32>
    tpu.vector_store %arg4[%c0_119, %c0_120, %c112], %105 {strides = array<i32>} : memref<1x8x256xf32, #tpu.memory_space<vmem>>, vector<1x8x16xf32>,
    %106 = vector.extract_strided_slice %73 {offsets = [0, 192], sizes = [8, 16], strides = [1, 1]} : vector<8x384xf32> to vector<8x16xf32>
    %c0_121 = arith.constant 0 : index
    %c0_122 = arith.constant 0 : index
    %c128 = arith.constant 128 : index
    %107 = vector.load %arg4[%c0_121, %c0_122, %c128] : memref<1x8x256xf32, #tpu.memory_space<vmem>>, vector<1x8x16xf32>
    %108 = vector.shape_cast %107 : vector<1x8x16xf32> to vector<8x16xf32>
    %109 = vector.shape_cast %106 : vector<8x16xf32> to vector<1x8x16xf32>
    tpu.vector_store %arg4[%c0_121, %c0_122, %c128], %109 {strides = array<i32>} : memref<1x8x256xf32, #tpu.memory_space<vmem>>, vector<1x8x16xf32>,
    %110 = vector.extract_strided_slice %73 {offsets = [0, 216], sizes = [8, 16], strides = [1, 1]} : vector<8x384xf32> to vector<8x16xf32>
    %c0_123 = arith.constant 0 : index
    %c0_124 = arith.constant 0 : index
    %c144 = arith.constant 144 : index
    %111 = vector.load %arg4[%c0_123, %c0_124, %c144] : memref<1x8x256xf32, #tpu.memory_space<vmem>>, vector<1x8x16xf32>
    %112 = vector.shape_cast %111 : vector<1x8x16xf32> to vector<8x16xf32>
    %113 = vector.shape_cast %110 : vector<8x16xf32> to vector<1x8x16xf32>
    tpu.vector_store %arg4[%c0_123, %c0_124, %c144], %113 {strides = array<i32>} : memref<1x8x256xf32, #tpu.memory_space<vmem>>, vector<1x8x16xf32>,
    %114 = vector.extract_strided_slice %73 {offsets = [0, 240], sizes = [8, 16], strides = [1, 1]} : vector<8x384xf32> to vector<8x16xf32>
    %c0_125 = arith.constant 0 : index
    %c0_126 = arith.constant 0 : index
    %c160 = arith.constant 160 : index
    %115 = vector.load %arg4[%c0_125, %c0_126, %c160] : memref<1x8x256xf32, #tpu.memory_space<vmem>>, vector<1x8x16xf32>
    %116 = vector.shape_cast %115 : vector<1x8x16xf32> to vector<8x16xf32>
    %117 = vector.shape_cast %114 : vector<8x16xf32> to vector<1x8x16xf32>
    tpu.vector_store %arg4[%c0_125, %c0_126, %c160], %117 {strides = array<i32>} : memref<1x8x256xf32, #tpu.memory_space<vmem>>, vector<1x8x16xf32>,
    %118 = vector.extract_strided_slice %73 {offsets = [0, 264], sizes = [8, 16], strides = [1, 1]} : vector<8x384xf32> to vector<8x16xf32>
    %c0_127 = arith.constant 0 : index
    %c0_128 = arith.constant 0 : index
    %c176 = arith.constant 176 : index
    %119 = vector.load %arg4[%c0_127, %c0_128, %c176] : memref<1x8x256xf32, #tpu.memory_space<vmem>>, vector<1x8x16xf32>
    %120 = vector.shape_cast %119 : vector<1x8x16xf32> to vector<8x16xf32>
    %121 = vector.shape_cast %118 : vector<8x16xf32> to vector<1x8x16xf32>
    tpu.vector_store %arg4[%c0_127, %c0_128, %c176], %121 {strides = array<i32>} : memref<1x8x256xf32, #tpu.memory_space<vmem>>, vector<1x8x16xf32>,
    %122 = vector.extract_strided_slice %73 {offsets = [0, 288], sizes = [8, 16], strides = [1, 1]} : vector<8x384xf32> to vector<8x16xf32>
    %c0_129 = arith.constant 0 : index
    %c0_130 = arith.constant 0 : index
    %c192 = arith.constant 192 : index
    %123 = vector.load %arg4[%c0_129, %c0_130, %c192] : memref<1x8x256xf32, #tpu.memory_space<vmem>>, vector<1x8x16xf32>
    %124 = vector.shape_cast %123 : vector<1x8x16xf32> to vector<8x16xf32>
    %125 = vector.shape_cast %122 : vector<8x16xf32> to vector<1x8x16xf32>
    tpu.vector_store %arg4[%c0_129, %c0_130, %c192], %125 {strides = array<i32>} : memref<1x8x256xf32, #tpu.memory_space<vmem>>, vector<1x8x16xf32>,
    %126 = vector.extract_strided_slice %73 {offsets = [0, 312], sizes = [8, 16], strides = [1, 1]} : vector<8x384xf32> to vector<8x16xf32>
    %c0_131 = arith.constant 0 : index
    %c0_132 = arith.constant 0 : index
    %c208 = arith.constant 208 : index
    %127 = vector.load %arg4[%c0_131, %c0_132, %c208] : memref<1x8x256xf32, #tpu.memory_space<vmem>>, vector<1x8x16xf32>
    %128 = vector.shape_cast %127 : vector<1x8x16xf32> to vector<8x16xf32>
    %129 = vector.shape_cast %126 : vector<8x16xf32> to vector<1x8x16xf32>
    tpu.vector_store %arg4[%c0_131, %c0_132, %c208], %129 {strides = array<i32>} : memref<1x8x256xf32, #tpu.memory_space<vmem>>, vector<1x8x16xf32>,
    %130 = vector.extract_strided_slice %73 {offsets = [0, 336], sizes = [8, 16], strides = [1, 1]} : vector<8x384xf32> to vector<8x16xf32>
    %c0_133 = arith.constant 0 : index
    %c0_134 = arith.constant 0 : index
    %c224 = arith.constant 224 : index
    %131 = vector.load %arg4[%c0_133, %c0_134, %c224] : memref<1x8x256xf32, #tpu.memory_space<vmem>>, vector<1x8x16xf32>
    %132 = vector.shape_cast %131 : vector<1x8x16xf32> to vector<8x16xf32>
    %133 = vector.shape_cast %130 : vector<8x16xf32> to vector<1x8x16xf32>
    tpu.vector_store %arg4[%c0_133, %c0_134, %c224], %133 {strides = array<i32>} : memref<1x8x256xf32, #tpu.memory_space<vmem>>, vector<1x8x16xf32>,
    %134 = vector.extract_strided_slice %73 {offsets = [0, 360], sizes = [8, 16], strides = [1, 1]} : vector<8x384xf32> to vector<8x16xf32>
    %c0_135 = arith.constant 0 : index
    %c0_136 = arith.constant 0 : index
    %c240 = arith.constant 240 : index
    %135 = vector.load %arg4[%c0_135, %c0_136, %c240] : memref<1x8x256xf32, #tpu.memory_space<vmem>>, vector<1x8x16xf32>
    %136 = vector.shape_cast %135 : vector<1x8x16xf32> to vector<8x16xf32>
    %137 = vector.shape_cast %134 : vector<8x16xf32> to vector<1x8x16xf32>
    tpu.vector_store %arg4[%c0_135, %c0_136, %c240], %137 {strides = array<i32>} : memref<1x8x256xf32, #tpu.memory_space<vmem>>, vector<1x8x16xf32>,
    return
  }
  func.func @transform_0(%arg0: i32) -> (i32, i32, i32, i32) {
    %c0_i32 = arith.constant 0 : i32
    %c0_i32_0 = arith.constant 0 : i32
    %c0_i32_1 = arith.constant 0 : i32
    %c0_i32_2 = arith.constant 0 : i32
    return %arg0, %c0_i32, %c0_i32_0, %c0_i32_1 : i32, i32, i32, i32
  }
  func.func @transform_1(%arg0: i32) -> (i32, i32) {
    %c0_i32 = arith.constant 0 : i32
    %c0_i32_0 = arith.constant 0 : i32
    %c0_i32_1 = arith.constant 0 : i32
    return %c0_i32, %c0_i32_0 : i32, i32
  }
  func.func @transform_2(%arg0: i32) -> (i32, i32) {
    %c0_i32 = arith.constant 0 : i32
    %c0_i32_0 = arith.constant 0 : i32
    %c0_i32_1 = arith.constant 0 : i32
    return %c0_i32, %c0_i32_0 : i32, i32
  }
  func.func @transform_3(%arg0: i32) -> (i32, i32, i32) {
    %c0_i32 = arith.constant 0 : i32
    %c0_i32_0 = arith.constant 0 : i32
    %c0_i32_1 = arith.constant 0 : i32
    return %arg0, %c0_i32, %c0_i32_0 : i32, i32, i32
  }
}

</mosaic_0001>

<bundles_post_ra>
// kernel: conv2d_pallas.1
= control target key start
LH: loop header
LB: loop body
LE: loop exit
PB: predicated region body
PF: predicated region fallthrough
CT: control target
= control target key end

     0   :  { %s1225_s12 = smov 0   ;;  %s1503_s0 = inlined_call_operand.vmem [shape: f32[2,4,16,16], index: 0, kind: input, shape index: {}]   ;;  %s1504_s1 = inlined_call_operand.vmem [shape: f32[8,36], index: 1, kind: input, shape index: {}]   ;;  %s1505_s2 = inlined_call_operand.vmem [shape: f32[8,1], index: 2, kind: input, shape index: {}]   ;;  %s1506_s3 = inlined_call_operand.vmem [shape: f32[2,8,256], index: 3, kind: output, shape index: {}]  }
   0x1 LB: > { %s1051_s13 = sadd.s32 4294967295, %s1162_s12   ;;  %p1055_p0 = scmp.ge.s32.totalorder %s1162_s12, 1  ;;  %s1162_s12 = sphi %s1225_s12, %s13_s12  }
   0x2   : > { %p137_p1 = scmp.lt.s32.totalorder %s1162_s12, 3 }
   0x4   : > { %p138_p2 = pnand %p1055_p0, %p137_p1 }
   0x5   : > { %p161_p3 = scmp.lt.s32.totalorder (!%p138_p2), %s1051_s13, 1  ;;  %v1164_v0 = vmov (!%p138_p2), 0.0   ;;  %vm185_vm0 = vcmask (!%p138_p2), 1041409   ;;  %vm187_vm1 = vcmask (!%p138_p2), 1045509   ;;  %vm190_vm2 = vcmask (!%p138_p2), 1042434   ;;  %s1165_s18 = smov (!%p138_p2), 121  }
   0x6   : > { %141 = sbr.rel (%p138_p2) target bundleno = 718 (0x2ce), region = 32  ;;  %171 = vst [vmem:[#allocation2] sm:$0xff] (!%p138_p2), %v1164_v0  ;;  %843 = vmatprep.mubr.f32.mxu0 (!%p138_p2), %v1164_v0  ;;  %vm192_vm3 = vcmask (!%p138_p2), 1046534   ;;  %vm195_vm4 = vcmask (!%p138_p2), 1043459   ;;  %vm197_vm5 = vcmask (!%p138_p2), 1047559   ;;  %s1166_s19 = smov (!%p138_p2), 25  }
   0x7   : > { %s1167_s20 = smov (!%p138_p2), 73   ;;  %s1168_s21 = smov (!%p138_p2), 49   ;;  %vm172_vm6 = vcmask (!%p138_p2), 1043456   ;;  %vm173_vm7 = vcmask (!%p138_p2), 408580   ;;  %vm202_vm9 = vcmask (!%p138_p2), 330952   ;;  %vm224_vm10 = vcmask (!%p138_p2), 527752  }
   0x8   : > { %s1169_s22 = smov (!%p138_p2), 17   ;;  %s1170_s23 = smov (!%p138_p2), 97   ;;  %vm174_vm8 = vmor (!%p138_p2), %vm173_vm7, %vm172_vm6  ;;  %vm246_vm11 = vcmask (!%p138_p2), 724552   ;;  %vm293_vm12 = vcmask (!%p138_p2), 1044424   ;;  %vm294_vm13 = vcmask (!%p138_p2), 72708   ;;  %vm290_vm14 = vcmask (!%p138_p2), 990208  }
   0x9   : > { %s1171_s24 = smov (!%p138_p2), 113   ;;  %s1172_s25 = smov (!%p138_p2), 41   ;;  %175 = vst.msk [vmem:[#allocation2 + $0x8] sm:$0xff] (!%p138_p2), %vm174_vm8, %v1164_v0  ;;  %vm268_vm15 = vcmask (!%p138_p2), 921352   ;;  %vm405_vm7 = vcmask (!%p138_p2), 924672   ;;  %vm383_vm8 = vcmask (!%p138_p2), 855752  }
   0xa   : > { %s1173_s26 = smov (!%p138_p2), 65   ;;  %s1174_s27 = smov (!%p138_p2), 89  }
   0xb   : > { %s1175_s28 = smov (!%p138_p2), 9   ;;  %s1176_s29 = smov (!%p138_p2), 33  }
   0xc   : > { %s1177_s30 = smov (!%p138_p2), 57   ;;  %s1178_s4 = smov (!%p138_p2), 81  }
   0xd   : > { %s1508_s13 = smov (!%p161_p3, %s1051_s13), 1  ;;  %s1179_s5 = smov 1  }
   0xe   : > { %s1067_s14 = sshll.u32 %s1508_s13, 6  ;;  %s1180_s6 = smov 105  }
   0xf   : > { %s1241_s17 = scalar_lea.vmem %s1503_s0, %s1067_s14  ;;  %s1181_s7 = smov 126  }
  0x10   : > { %v270_v1 = vld [vmem:[%s1241_s17 + $0x4] sm:$0x1]  ;;  %v271_v2 = vld [vmem:[%s1241_s17 + $0x14] sm:$0x1]  ;;  %v176_v7 = vld [vmem:[%s1241_s17] sm:$0x1] }
  0x11   : > { %v272_v3 = vld [vmem:[%s1241_s17 + $0x24] sm:$0x1]  ;;  %v273_v4 = vld [vmem:[%s1241_s17 + $0x34] sm:$0x1]  ;;  %v278_v5 = vrot.slane %v271_v2, 7  ;;  %s1182_s8 = smov 127  }
  0x12   : > { %v281_v6 = vrot.slane %v272_v3, 6  ;;  %v284_v8 = vrot.slane %v273_v4, 5  ;;  %v177_v9 = vld [vmem:[%s1241_s17 + $0x10] sm:$0x1]  ;;  %v178_v10 = vld [vmem:[%s1241_s17 + $0x20] sm:$0x1] }
  0x13   : > { %v279_v11 = vsel %vm185_vm0, %v278_v5, %v270_v1  ;;  %v179_v12 = vld [vmem:[%s1241_s17 + $0x30] sm:$0x1]  ;;  %v184_v13 = vrot.slane %v177_v9, 7  ;;  %v189_v14 = vrot.slane %v178_v10, 6  ;;  %v226_v15 = vld [vmem:[%s1241_s17 + $0x2] sm:$0x1] }
  0x14   : > { %v280_v16 = vsel %vm187_vm1, %v278_v5, %v279_v11  ;;  %v194_v17 = vrot.slane %v179_v12, 5  ;;  %v227_v18 = vld [vmem:[%s1241_s17 + $0x12] sm:$0x1]  ;;  %v228_v19 = vld [vmem:[%s1241_s17 + $0x22] sm:$0x1]  ;;  %s1183_s9 = smov 102  }
  0x15   : > { %v282_v20 = vsel %vm190_vm2, %v281_v6, %v280_v16  ;;  %v186_v21 = vsel %vm185_vm0, %v184_v13, %v176_v7  ;;  %v229_v22 = vld [vmem:[%s1241_s17 + $0x32] sm:$0x1]  ;;  %v234_v23 = vrot.slane %v227_v18, 7  ;;  %v237_v24 = vrot.slane %v228_v19, 6  ;;  %v204_v25 = vld [vmem:[%s1241_s17 + $0x1] sm:$0x1] }
  0x16   : > { %v283_v26 = vsel %vm192_vm3, %v281_v6, %v282_v20  ;;  %v188_v27 = vsel %vm187_vm1, %v184_v13, %v186_v21  ;;  %v240_v28 = vrot.slane %v229_v22, 5  ;;  %v205_v29 = vld [vmem:[%s1241_s17 + $0x11] sm:$0x1]  ;;  %v206_v30 = vld [vmem:[%s1241_s17 + $0x21] sm:$0x1]  ;;  %s1184_s10 = smov 104  }
  0x17   : > { %v285_v31 = vsel %vm195_vm4, %v284_v8, %v283_v26  ;;  %v191_v32 = vsel %vm190_vm2, %v189_v14, %v188_v27  ;;  %v235_v33 = vsel %vm185_vm0, %v234_v23, %v226_v15  ;;  %v207_v34 = vld [vmem:[%s1241_s17 + $0x31] sm:$0x1]  ;;  %v212_v35 = vrot.slane %v205_v29, 7  ;;  %v298_v40 = vld [vmem:[%s1241_s17 + $0x15] sm:$0x1]  ;;  %s1185_s11 = smov 79  }
  0x18   : > { %v286_v36 = vsel %vm197_vm5, %v284_v8, %v285_v31  ;;  %v193_v37 = vsel %vm192_vm3, %v189_v14, %v191_v32  ;;  %v236_v38 = vsel %vm187_vm1, %v234_v23, %v235_v33  ;;  %v215_v39 = vrot.slane %v206_v30, 6  ;;  %v299_v41 = vld [vmem:[%s1241_s17 + $0x25] sm:$0x1]  ;;  %v300_v47 = vld [vmem:[%s1241_s17 + $0x35] sm:$0x1]  ;;  %s1186_s14 = smov 103  }
  0x19   : > { %287 = vrot.lane.b32.xlu1 %v286_v36, %s1165_s18  ;;  %v196_v42 = vsel %vm195_vm4, %v194_v17, %v193_v37  ;;  %v238_v43 = vsel %vm190_vm2, %v237_v24, %v236_v38  ;;  %v213_v44 = vsel %vm185_vm0, %v212_v35, %v204_v25  ;;  %v218_v45 = vrot.slane %v207_v34, 5  ;;  %v297_v46 = vld [vmem:[%s1241_s17 + $0x5] sm:$0x1]  ;;  %v249_v52 = vld [vmem:[%s1241_s17 + $0x13] sm:$0x1]  ;;  %s1187_s15 = smov 80  }
  0x1a   : > { %v198_v48 = vsel %vm197_vm5, %v194_v17, %v196_v42  ;;  %v239_v49 = vsel %vm192_vm3, %v237_v24, %v238_v43  ;;  %v214_v50 = vsel %vm187_vm1, %v212_v35, %v213_v44  ;;  %v305_v51 = vrot.slane %v298_v40, 7  ;;  %v250_v53 = vld [vmem:[%s1241_s17 + $0x23] sm:$0x1]  ;;  %v251_v59 = vld [vmem:[%s1241_s17 + $0x33] sm:$0x1]  ;;  %s1188_s16 = smov 78  }
  0x1b   : > { %199 = vrot.lane.b32.xlu0 %v198_v48, %s1166_s19  ;;  %v241_v54 = vsel %vm195_vm4, %v240_v28, %v239_v49  ;;  %v216_v55 = vsel %vm190_vm2, %v215_v39, %v214_v50  ;;  %v308_v56 = vrot.slane %v299_v41, 6  ;;  %v311_v57 = vrot.slane %v300_v47, 5  ;;  %v248_v58 = vld [vmem:[%s1241_s17 + $0x3] sm:$0x1]  ;;  %v386_v1 = vld [vmem:[%s1241_s17 + $0x19] sm:$0x1] }
  0x1c   : > { %v242_v60 = vsel %vm197_vm5, %v240_v28, %v241_v54  ;;  %v217_v61 = vsel %vm192_vm3, %v215_v39, %v216_v55  ;;  %v306_v62 = vsel %vm185_vm0, %v305_v51, %v297_v46  ;;  %v256_v63 = vrot.slane %v249_v52, 7  ;;  %v387_v2 = vld [vmem:[%s1241_s17 + $0x29] sm:$0x1]  ;;  %v388_v8 = vld [vmem:[%s1241_s17 + $0x39] sm:$0x1] }
  0x1d   : > { %243 = vrot.lane.b32.xlu1 %v242_v60, %s1167_s20  ;;  %v219_v3 = vsel %vm195_vm4, %v218_v45, %v217_v61  ;;  %v307_v4 = vsel %vm187_vm1, %v305_v51, %v306_v62  ;;  %v259_v5 = vrot.slane %v250_v53, 6  ;;  %v262_v6 = vrot.slane %v251_v59, 5  ;;  %v385_v7 = vld [vmem:[%s1241_s17 + $0x9] sm:$0x1]  ;;  %v320_v13 = vld [vmem:[%s1241_s17 + $0x16] sm:$0x1] }
  0x1e   : > { %v220_v9 = vsel %vm197_vm5, %v218_v45, %v219_v3  ;;  %v309_v10 = vsel %vm190_vm2, %v308_v56, %v307_v4  ;;  %v257_v11 = vsel %vm185_vm0, %v256_v63, %v248_v58  ;;  %v393_v12 = vrot.slane %v386_v1, 7  ;;  %v321_v14 = vld [vmem:[%s1241_s17 + $0x26] sm:$0x1]  ;;  %v322_v20 = vld [vmem:[%s1241_s17 + $0x36] sm:$0x1] }
  0x1f   : > { %221 = vrot.lane.b32.xlu0 %v220_v9, %s1168_s21  ;;  %v310_v15 = vsel %vm192_vm3, %v308_v56, %v309_v10  ;;  %v258_v16 = vsel %vm187_vm1, %v256_v63, %v257_v11  ;;  %v396_v17 = vrot.slane %v387_v2, 6  ;;  %v399_v18 = vrot.slane %v388_v8, 5  ;;  %v319_v19 = vld [vmem:[%s1241_s17 + $0x6] sm:$0x1]  ;;  %v342_v25 = vld [vmem:[%s1241_s17 + $0x17] sm:$0x1] }
  0x20   : > { %v312_v21 = vsel %vm195_vm4, %v311_v57, %v310_v15  ;;  %v260_v22 = vsel %vm190_vm2, %v259_v5, %v258_v16  ;;  %v394_v23 = vsel %vm185_vm0, %v393_v12, %v385_v7  ;;  %v327_v24 = vrot.slane %v320_v13, 7  ;;  %v343_v30 = vld [vmem:[%s1241_s17 + $0x27] sm:$0x1]  ;;  %v344_v31 = vld [vmem:[%s1241_s17 + $0x37] sm:$0x1]  ;;  %s1068_s21 = sshll.u32 %s1508_s13, 4 }
  0x21   : > { %v313_v26 = vsel %vm197_vm5, %v311_v57, %v312_v21  ;;  %v261_v27 = vsel %vm192_vm3, %v259_v5, %v260_v22  ;;  %v395_v28 = vsel %vm187_vm1, %v393_v12, %v394_v23  ;;  %v330_v29 = vrot.slane %v321_v14, 6  ;;  %v341_v36 = vld [vmem:[%s1241_s17 + $0x7] sm:$0x1]  ;;  %v364_v37 = vld [vmem:[%s1241_s17 + $0x18] sm:$0x1]  ;;  %s1194_s13 = smov 16  }
  0x22   : > { %314 = vrot.lane.b32.xlu1 %v313_v26, %s1169_s22  ;;  %v263_v32 = vsel %vm195_vm4, %v262_v6, %v261_v27  ;;  %v397_v33 = vsel %vm190_vm2, %v396_v17, %v395_v28  ;;  %v328_v34 = vsel %vm185_vm0, %v327_v24, %v319_v19  ;;  %v333_v35 = vrot.slane %v322_v20, 5  ;;  %v365_v42 = vld [vmem:[%s1241_s17 + $0x28] sm:$0x1]  ;;  %v366_v43 = vld [vmem:[%s1241_s17 + $0x38] sm:$0x1] }
  0x23   : > { %v264_v38 = vsel %vm197_vm5, %v262_v6, %v263_v32  ;;  %v398_v39 = vsel %vm192_vm3, %v396_v17, %v397_v33  ;;  %v329_v40 = vsel %vm187_vm1, %v327_v24, %v328_v34  ;;  %v349_v41 = vrot.slane %v342_v25, 7  ;;  %v363_v48 = vld [vmem:[%s1241_s17 + $0x8] sm:$0x1]  ;;  %v413_v49 = vld [vmem:[%s1241_s17 + $0x1a] sm:$0x1] }
  0x24   : > { %265 = vrot.lane.b32.xlu0 %v264_v38, %s1170_s23  ;;  %v400_v44 = vsel %vm195_vm4, %v399_v18, %v398_v39  ;;  %v331_v45 = vsel %vm190_vm2, %v330_v29, %v329_v40  ;;  %v352_v46 = vrot.slane %v343_v30, 6  ;;  %v355_v47 = vrot.slane %v344_v31, 5  ;;  %v414_v54 = vld [vmem:[%s1241_s17 + $0x2a] sm:$0x1]  ;;  %v415_v55 = vld [vmem:[%s1241_s17 + $0x3a] sm:$0x1] }
  0x25   : > { %v401_v50 = vsel %vm197_vm5, %v399_v18, %v400_v44  ;;  %v332_v51 = vsel %vm192_vm3, %v330_v29, %v331_v45  ;;  %v350_v52 = vsel %vm185_vm0, %v349_v41, %v341_v36  ;;  %v371_v53 = vrot.slane %v364_v37, 7  ;;  %v412_v60 = vld [vmem:[%s1241_s17 + $0xa] sm:$0x1]  ;;  %v435_v61 = vld [vmem:[%s1241_s17 + $0x1b] sm:$0x1] }
  0x26   : > { %402 = vrot.lane.b32.xlu1 %v401_v50, %s1171_s24  ;;  %v334_v56 = vsel %vm195_vm4, %v333_v35, %v332_v51  ;;  %v351_v57 = vsel %vm187_vm1, %v349_v41, %v350_v52  ;;  %v374_v58 = vrot.slane %v365_v42, 6  ;;  %v377_v59 = vrot.slane %v366_v43, 5  ;;  %v436_v3 = vld [vmem:[%s1241_s17 + $0x2b] sm:$0x1]  ;;  %v437_v9 = vld [vmem:[%s1241_s17 + $0x3b] sm:$0x1]  ;;  %s1474_s24 = scalar_lea.vmem %s1506_s3, %s1068_s21 }
  0x27   : > { %v335_v62 = vsel %vm197_vm5, %v333_v35, %v334_v56  ;;  %v353_v63 = vsel %vm190_vm2, %v352_v46, %v351_v57  ;;  %v372_v1 = vsel %vm185_vm0, %v371_v53, %v363_v48  ;;  %v420_v2 = vrot.slane %v413_v49, 7  ;;  %v434_v8 = vld [vmem:[%s1241_s17 + $0xb] sm:$0x1]  ;;  %v457_v14 = vld [vmem:[%s1241_s17 + $0x1c] sm:$0x1] }
  0x28   : > { %336 = vrot.lane.b32.xlu0 %v335_v62, %s1172_s25  ;;  %v354_v4 = vsel %vm192_vm3, %v352_v46, %v353_v63  ;;  %v373_v5 = vsel %vm187_vm1, %v371_v53, %v372_v1  ;;  %v423_v6 = vrot.slane %v414_v54, 6  ;;  %v426_v7 = vrot.slane %v415_v55, 5  ;;  %v458_v19 = vld [vmem:[%s1241_s17 + $0x2c] sm:$0x1]  ;;  %v459_v20 = vld [vmem:[%s1241_s17 + $0x3c] sm:$0x1] }
  0x29   : > { %v356_v10 = vsel %vm195_vm4, %v355_v47, %v354_v4  ;;  %v375_v11 = vsel %vm190_vm2, %v374_v58, %v373_v5  ;;  %v421_v12 = vsel %vm185_vm0, %v420_v2, %v412_v60  ;;  %v442_v13 = vrot.slane %v435_v61, 7  ;;  %v456_v25 = vld [vmem:[%s1241_s17 + $0xc] sm:$0x1]  ;;  %v479_v26 = vld [vmem:[%s1241_s17 + $0x1d] sm:$0x1]  ;;  %s1192_s25 = smov 24  }
  0x2a   : > { %v357_v15 = vsel %vm197_vm5, %v355_v47, %v356_v10  ;;  %v376_v16 = vsel %vm192_vm3, %v374_v58, %v375_v11  ;;  %v422_v17 = vsel %vm187_vm1, %v420_v2, %v421_v12  ;;  %v445_v18 = vrot.slane %v436_v3, 6  ;;  %v480_v31 = vld [vmem:[%s1241_s17 + $0x2d] sm:$0x1]  ;;  %v481_v32 = vld [vmem:[%s1241_s17 + $0x3d] sm:$0x1] }
  0x2b   : > { %v378_v21 = vsel %vm195_vm4, %v377_v59, %v376_v16  ;;  %v424_v22 = vsel %vm190_vm2, %v423_v6, %v422_v17  ;;  %v443_v23 = vsel %vm185_vm0, %v442_v13, %v434_v8  ;;  %v448_v24 = vrot.slane %v437_v9, 5  ;;  %v478_v37 = vld [vmem:[%s1241_s17 + $0xd] sm:$0x1]  ;;  %v523_v38 = vld [vmem:[%s1241_s17 + $0x1f] sm:$0x1] }
  0x2c   : > { %358 = vrot.lane.b32.xlu0 %v357_v15, %s1173_s26  ;;  %v379_v27 = vsel %vm197_vm5, %v377_v59, %v378_v21  ;;  %v425_v28 = vsel %vm192_vm3, %v423_v6, %v424_v22  ;;  %v444_v29 = vsel %vm187_vm1, %v442_v13, %v443_v23  ;;  %v464_v30 = vrot.slane %v457_v14, 7  ;;  %v524_v43 = vld [vmem:[%s1241_s17 + $0x2f] sm:$0x1]  ;;  %v525_v44 = vld [vmem:[%s1241_s17 + $0x3f] sm:$0x1]  ;;  %s1193_s26 = smov 40  }
  0x2d   : > { %380 = vrot.lane.b32.xlu1 %v379_v27, %s1174_s27  ;;  %v427_v33 = vsel %vm195_vm4, %v426_v7, %v425_v28  ;;  %v446_v34 = vsel %vm190_vm2, %v445_v18, %v444_v29  ;;  %v467_v35 = vrot.slane %v458_v19, 6  ;;  %v470_v36 = vrot.slane %v459_v20, 5  ;;  %v522_v49 = vld [vmem:[%s1241_s17 + $0xf] sm:$0x1]  ;;  %v501_v50 = vld [vmem:[%s1241_s17 + $0x1e] sm:$0x1] }
  0x2e   : > { %v428_v39 = vsel %vm197_vm5, %v426_v7, %v427_v33  ;;  %v447_v40 = vsel %vm192_vm3, %v445_v18, %v446_v34  ;;  %v465_v41 = vsel %vm185_vm0, %v464_v30, %v456_v25  ;;  %v486_v42 = vrot.slane %v479_v26, 7  ;;  %v502_v55 = vld [vmem:[%s1241_s17 + $0x2e] sm:$0x1]  ;;  %v503_v61 = vld [vmem:[%s1241_s17 + $0x3e] sm:$0x1]  ;;  %s1195_s27 = smov 32  }
  0x2f   : > { %v449_v45 = vsel %vm195_vm4, %v448_v24, %v447_v40  ;;  %v466_v46 = vsel %vm187_vm1, %v464_v30, %v465_v41  ;;  %v489_v47 = vrot.slane %v480_v31, 6  ;;  %v492_v48 = vrot.slane %v481_v32, 5  ;;  %v500_v60 = vld [vmem:[%s1241_s17 + $0xe] sm:$0x1] }
  0x30   : > { %429 = vrot.lane.b32.xlu0 %v428_v39, %s1175_s28  ;;  %v450_v51 = vsel %vm197_vm5, %v448_v24, %v449_v45  ;;  %v468_v52 = vsel %vm190_vm2, %v467_v35, %v466_v46  ;;  %v487_v53 = vsel %vm185_vm0, %v486_v42, %v478_v37  ;;  %v530_v54 = vrot.slane %v523_v38, 7  ;;  %s1196_s28 = smov 88  }
  0x31   : > { %451 = vrot.lane.b32.xlu1 %v450_v51, %s1176_s29  ;;  %v469_v56 = vsel %vm192_vm3, %v467_v35, %v468_v52  ;;  %v488_v57 = vsel %vm187_vm1, %v486_v42, %v487_v53  ;;  %v533_v58 = vrot.slane %v524_v43, 6  ;;  %v536_v59 = vrot.slane %v525_v44, 5  ;;  %s1197_s29 = smov 120  }
  0x32   : > { %v471_v62 = vsel %vm195_vm4, %v470_v36, %v469_v56  ;;  %v490_v63 = vsel %vm190_vm2, %v489_v47, %v488_v57  ;;  %v531_v1 = vsel %vm185_vm0, %v530_v54, %v522_v49  ;;  %v508_v2 = vrot.slane %v501_v50, 7  ;;  %v760_v49 = vld [vmem:[%s1505_s2] sm:$0xff] }
  0x33   : > { %v472_v3 = vsel %vm197_vm5, %v470_v36, %v471_v62  ;;  %v491_v4 = vsel %vm192_vm3, %v489_v47, %v490_v63  ;;  %v532_v5 = vsel %vm187_vm1, %v530_v54, %v531_v1  ;;  %v511_v6 = vrot.slane %v502_v55, 6 }
  0x34   : > { %473 = vrot.lane.b32.xlu0 %v472_v3, %s1177_s30  ;;  %v493_v7 = vsel %vm195_vm4, %v492_v48, %v491_v4  ;;  %v534_v8 = vsel %vm190_vm2, %v533_v58, %v532_v5  ;;  %v509_v9 = vsel %vm185_vm0, %v508_v2, %v500_v60  ;;  %v514_v10 = vrot.slane %v503_v61, 5  ;;  %vm295_vm0 = vmor %vm294_vm13, %vm293_vm12  ;;  %s1198_s30 = smov 56  }
  0x35   : > { %v494_v11 = vsel %vm197_vm5, %v492_v48, %v493_v7  ;;  %v535_v12 = vsel %vm192_vm3, %v533_v58, %v534_v8  ;;  %v510_v13 = vsel %vm187_vm1, %v508_v2, %v509_v9  ;;  %vm317_vm1 = vcmask 265352  }
  0x36   : > { %495 = vrot.lane.b32.xlu1 %v494_v11, %s1178_s4  ;;  %v537_v14 = vsel %vm195_vm4, %v536_v59, %v535_v12  ;;  %v512_v15 = vsel %vm190_vm2, %v511_v6, %v510_v13  ;;  %vm339_vm2 = vcmask 462152   ;;  %vm476_vm12 = vcmask 593352   ;;  %s1199_s4 = smov 112  }
  0x37   : > { %v538_v16 = vsel %vm197_vm5, %v536_v59, %v537_v14  ;;  %v513_v17 = vsel %vm192_vm3, %v511_v6, %v512_v15  ;;  %vm408_vm3 = vcmask 1044360   ;;  %vm498_vm13 = vcmask 790152  }
  0x38   : > { %v515_v18 = vsel %vm195_vm4, %v514_v10, %v513_v17  ;;  %vm409_vm4 = vcmask 7172   ;;  %v1189_v46 = vmov 0.0|0.0   ;;  %v1191_v48 = vmov 0  }
  0x39   : > { %v516_v19 = vsel %vm197_vm5, %v514_v10, %v515_v18  ;;  %vm361_vm5 = vcmask 658952   ;;  %1096 = vmatprep.subr.bf16.mxu1 %v1189_v46  ;;  %1151 = vset.pattern.permute.xlu0 %v1191_v48 }
  0x3a   : > { %539 = vrot.lane.b32.xlu1 %v538_v16, %s1179_s5  ;;  %517 = vrot.lane.b32.xlu0 %v516_v19, %s1180_s6  ;;  %s1200_s5 = smov 48   ;;  %s1201_s6 = smov 96  }
  0x8b   : > { %v288_v20 = vpop.permute.xlu1 %287 }
  0x8c   : > { %v289_v24 = vrot.slane %v288_v20, 4 }
  0x8d   : > { %v200_v21 = vpop.permute.xlu0 %199 }
  0x8e   : > { %203 = vst.msk [vmem:[#allocation2] sm:$0xf] %vm202_vm9, %v200_v21  ;;  %v291_v27 = vsel %vm290_vm14, %v289_v24, %v288_v20  ;;  %vm410_vm9 = vmor %vm409_vm4, %vm408_vm3  ;;  %vm542_vm14 = vcmask 134152   ;;  %vm590_vm3 = vcmask 1031168   ;;  %vm662_vm4 = vcmask 834560  }
  0x8f   : > { %v244_v22 = vpop.permute.xlu1 %243 }
  0x91   : > { %v222_v23 = vpop.permute.xlu0 %221 }
  0x92   : > { %225 = vst.msk [vmem:[#allocation2] sm:$0xf] %vm224_vm10, %v222_v23  ;;  %vm432_vm10 = vcmask 199752  }
  0x93   : > { %247 = vst.msk [vmem:[#allocation2] sm:$0xf] %vm246_vm11, %v244_v22  ;;  %vm454_vm11 = vcmask 396552  }
  0x94   : > { %v315_v25 = vpop.permute.xlu1 %314 }
  0x96   : > { %v266_v26 = vpop.permute.xlu0 %265 }
  0x97   : > { %269 = vst.msk [vmem:[#allocation2] sm:$0xf] %vm268_vm15, %v266_v26  ;;  %vm520_vm15 = vcmask 986952  }
  0x98   : > { %296 = vst.msk [vmem:[#allocation2] sm:$0xff] %vm295_vm0, %v291_v27  ;;  %v403_v28 = vpop.permute.xlu1 %402  ;;  %vm1190_vm0 = vmmov 0  }
  0x99   : > { %318 = vst.msk [vmem:[#allocation2 + $0x4] sm:$0xf] %vm317_vm1, %v315_v25  ;;  %v404_v30 = vrot.slane %v403_v28, 4  ;;  %1085 = vmatprep.mubr.msk.f32.mxu1 %vm1190_vm0, %v1164_v0  ;;  %vm638_vm1 = vcmask 842752   ;;  %vm951_vm0 = vcmask 786048  }
  0x9a   : > { %v337_v29 = vpop.permute.xlu0 %336 }
  0x9b   : > { %340 = vst.msk [vmem:[#allocation2 + $0x4] sm:$0xf] %vm339_vm2, %v337_v29  ;;  %v406_v33 = vsel %vm405_vm7, %v404_v30, %v403_v28  ;;  %vm686_vm2 = vcmask 654336   ;;  %vm710_vm7 = vcmask 646144  }
  0x9e   : > { %v359_v31 = vpop.permute.xlu0 %358 }
  0x9f   : > { %362 = vst.msk [vmem:[#allocation2 + $0x4] sm:$0xf] %vm361_vm5, %v359_v31  ;;  %v381_v32 = vpop.permute.xlu1 %380  ;;  %vm566_vm5 = vcmask 1039360  }
  0xa0   : > { %384 = vst.msk [vmem:[#allocation2 + $0x4] sm:$0xf] %vm383_vm8, %v381_v32  ;;  %vm614_vm8 = vcmask 850944  }
  0xa1   : > { %411 = vst.msk [vmem:[#allocation2 + $0x4] sm:$0xff] %vm410_vm9, %v406_v33  ;;  %vm734_vm9 = vcmask 637952  }
  0xa2   : > { %v430_v34 = vpop.permute.xlu0 %429 }
  0xa3   : > { %433 = vst.msk [vmem:[#allocation2 + $0x8] sm:$0xf] %vm432_vm10, %v430_v34  ;;  %v452_v35 = vpop.permute.xlu1 %451  ;;  %vm766_vm10 = vcmask 293888  }
  0xa4   : > { %455 = vst.msk [vmem:[#allocation2 + $0x8] sm:$0xf] %vm454_vm11, %v452_v35  ;;  %vm920_vm11 = vcmask 130048  }
  0xa6   : > { %v474_v36 = vpop.permute.xlu0 %473 }
  0xa7   : > { %477 = vst.msk [vmem:[#allocation2 + $0x8] sm:$0xf] %vm476_vm12, %v474_v36  ;;  %vm931_vm12 = vcmask 392448  }
  0xa8   : > { %v576_v37 = vld [vmem:[#allocation2] sm:$0xff]  ;;  %v496_v38 = vpop.permute.xlu1 %495 }
  0xa9   : > { %582 = vrot.lane.b32.xlu1 %v576_v37, %s1181_s7  ;;  %v580_v39 = vcombine.high %v576_v37, %v576_v37  ;;  %560 = vrot.lane.b32.xlu0 %v576_v37, %s1182_s8  ;;  %499 = vst.msk [vmem:[#allocation2 + $0x8] sm:$0xf] %vm498_vm13, %v496_v38  ;;  %549 = vst [vmem:[#allocation3] sm:$0xf] %v576_v37  ;;  %v556_v43 = vcombine.low %v576_v37, %v576_v37  ;;  %vm936_vm13 = vcmask 523648  }
  0xab   : > { %550 = vst [vmem:[#allocation3 + $0x8] sm:$0xf] %v580_v39 }
  0xac   : > { %v540_v40 = vpop.permute.xlu1 %539  ;;  %v518_v41 = vpop.permute.xlu0 %517 }
  0xad   : > { %656 = vrot.lane.b32.xlu1 %v576_v37, %s1183_s9  ;;  %608 = vrot.lane.b32.xlu0 %v576_v37, %s1184_s10  ;;  %543 = vst.msk [vmem:[#allocation2 + $0xc] sm:$0xf] %vm542_vm14, %v540_v40  ;;  %vm941_vm14 = vcmask 654848  }
  0xae   : > { %521 = vst.msk [vmem:[#allocation2 + $0x8] sm:$0xf] %vm520_vm15, %v518_v41  ;;  %vm948_vm15 = vcmask 719872  }
  0xb1   : > { %704 = vrot.lane.b32.xlu1 %v576_v37, %s1185_s11  ;;  %630 = vrot.lane.b32.xlu0 %v576_v37, %s1186_s14 }
  0xb5   : > { %v545_v42 = vld [vmem:[#allocation2 + $0x8] sm:$0xf]  ;;  %632 = vrot.lane.b32.xlu1 %v580_v39, %s1186_s14  ;;  %678 = vrot.lane.b32.xlu0 %v576_v37, %s1187_s15 }
  0xb6   : > { %551 = vst [vmem:[#allocation3 + $0x10] sm:$0xf] %v545_v42  ;;  %v625_v44 = vld [vmem:[#allocation2 + $0x8] sm:$0xff] }
  0xb7   : > { %v557_v45 = vcombine.low %v625_v44, %v625_v44  ;;  %v629_v47 = vcombine.high %v625_v44, %v625_v44 }
  0xb9   : > { %680 = vrot.lane.b32.xlu1 %v580_v39, %s1187_s15  ;;  %584 = vrot.lane.b32.xlu0 %v580_v39, %s1181_s7 }
  0xbd   : > { %654 = vrot.lane.b32.xlu1 %v556_v43, %s1183_s9  ;;  %558 = vrot.lane.b32.xlu0 %v556_v43, %s1182_s8 }
  0xc1   : > { %702 = vrot.lane.b32.xlu1 %v556_v43, %s1185_s11  ;;  %606 = vrot.lane.b32.xlu0 %v556_v43, %s1184_s10 }
  0xc5   : > { %634 = vrot.lane.b32.xlu0 %v625_v44, %s1186_s14  ;;  %586 = vrot.lane.b32.xlu1 %v625_v44, %s1181_s7 }
  0xc9   : > { %682 = vrot.lane.b32.xlu0 %v625_v44, %s1187_s15  ;;  %564 = vrot.lane.b32.xlu1 %v625_v44, %s1182_s8 }
  0xcd   : > { %728 = vrot.lane.b32.xlu0 %v580_v39, %s1188_s16  ;;  %612 = vrot.lane.b32.xlu1 %v625_v44, %s1184_s10 }
  0xd1   : > { %658 = vrot.lane.b32.xlu0 %v557_v45, %s1183_s9  ;;  %562 = vrot.lane.b32.xlu1 %v557_v45, %s1182_s8  ;;  %s1203_s8 = smov 64  }
  0xd5   : > { %706 = vrot.lane.b32.xlu0 %v557_v45, %s1185_s11  ;;  %610 = vrot.lane.b32.xlu1 %v557_v45, %s1184_s10 }
  0xd9   : > { %588 = vrot.lane.b32.xlu0 %v629_v47, %s1181_s7  ;;  %660 = vrot.lane.b32.xlu1 %v625_v44, %s1183_s9  ;;  %s1202_s7 = smov 72   ;;  %s1204_s9 = smov 8  }
  0xdd   : > { %636 = vrot.lane.b32.xlu0 %v629_v47, %s1186_s14  ;;  %708 = vrot.lane.b32.xlu1 %v625_v44, %s1185_s11 }
  0xe1   : > { %684 = vrot.lane.b32.xlu0 %v629_v47, %s1187_s15  ;;  %730 = vrot.lane.b32.xlu1 %v625_v44, %s1188_s16 }
  0xe5   : > { %726 = vrot.lane.b32.xlu0 %v576_v37, %s1188_s16  ;;  %732 = vrot.lane.b32.xlu1 %v629_v47, %s1188_s16 }
  0xe9   : > { %763 = vperm.xlu0 %1151, %v760_v49  }
 0x11b   : > { %v583_v50 = vpop.permute.xlu1 %582  ;;  %v561_v51 = vpop.permute.xlu0 %560 }
 0x11f   : > { %v657_v52 = vpop.permute.xlu1 %656  ;;  %v609_v53 = vpop.permute.xlu0 %608 }
 0x123   : > { %v705_v54 = vpop.permute.xlu1 %704  ;;  %v631_v55 = vpop.permute.xlu0 %630 }
 0x127   : > { %v633_v56 = vpop.permute.xlu1 %632  ;;  %v679_v57 = vpop.permute.xlu0 %678 }
 0x128   : > { %v639_v58 = vsel %vm638_vm1, %v631_v55, %v633_v56 }
 0x129   : > { %645 = vst [vmem:[#allocation3 + $0x30] sm:$0xf] %v639_v58 }
 0x12b   : > { %v681_v59 = vpop.permute.xlu1 %680  ;;  %v585_v60 = vpop.permute.xlu0 %584 }
 0x12c   : > { %v687_v61 = vsel %vm686_vm2, %v679_v57, %v681_v59  ;;  %v591_v62 = vsel %vm590_vm3, %v583_v50, %v585_v60 }
 0x12d   : > { %693 = vst [vmem:[#allocation3 + $0x48] sm:$0xf] %v687_v61  ;;  %597 = vst [vmem:[#allocation3 + $0x18] sm:$0xf] %v591_v62 }
 0x12f   : > { %v655_v63 = vpop.permute.xlu1 %654  ;;  %v559_v1 = vpop.permute.xlu0 %558 }
 0x130   : > { %v663_v2 = vsel %vm662_vm4, %v655_v63, %v657_v52  ;;  %v567_v3 = vsel %vm566_vm5, %v559_v1, %v561_v51  ;;  %v744_v63 = vld [vmem:[%s1504_s1] sm:$0xff] }
 0x131   : > { %669 = vst [vmem:[#allocation3 + $0x30] sm:$0xf0] %v663_v2  ;;  %573 = vst [vmem:[#allocation3] sm:$0xf0] %v567_v3 }
 0x133   : > { %v703_v4 = vpop.permute.xlu1 %702  ;;  %v607_v5 = vpop.permute.xlu0 %606 }
 0x134   : > { %v711_v6 = vsel %vm710_vm7, %v703_v4, %v705_v54  ;;  %v615_v7 = vsel %vm614_vm8, %v607_v5, %v609_v53 }
 0x135   : > { %717 = vst [vmem:[#allocation3 + $0x48] sm:$0xf0] %v711_v6  ;;  %621 = vst [vmem:[#allocation3 + $0x18] sm:$0xf0] %v615_v7 }
 0x137   : > { %v587_v8 = vpop.permute.xlu1 %586  ;;  %v635_v9 = vpop.permute.xlu0 %634 }
 0x138   : > { %v592_v10 = vsel %vm590_vm3, %v585_v60, %v587_v8  ;;  %v640_v11 = vsel %vm638_vm1, %v633_v56, %v635_v9  ;;  %v745_v40 = vld [vmem:[#allocation3] sm:$0xff] }
 0x139   : > { %598 = vst [vmem:[#allocation3 + $0x20] sm:$0xf] %v592_v10  ;;  %646 = vst [vmem:[#allocation3 + $0x38] sm:$0xf] %v640_v11 }
 0x13b   : > { %v565_v12 = vpop.permute.xlu1 %564  ;;  %v683_v13 = vpop.permute.xlu0 %682 }
 0x13c   : > { %v688_v14 = vsel %vm686_vm2, %v681_v59, %v683_v13  ;;  %v748_v33 = vld [vmem:[#allocation3 + $0x18] sm:$0xff]  ;;  %v754_v47 = vld [vmem:[#allocation3 + $0x48] sm:$0xff] }
 0x13d   : > { %694 = vst [vmem:[#allocation3 + $0x50] sm:$0xf] %v688_v14  ;;  %v1090_v41 = vpack.c.bf16 %v748_v33, %v745_v40 }
 0x13f   : > { %v613_v15 = vpop.permute.xlu1 %612  ;;  %v729_v16 = vpop.permute.xlu0 %728 }
 0x143   : > { %v563_v17 = vpop.permute.xlu1 %562  ;;  %v659_v18 = vpop.permute.xlu0 %658 }
 0x144   : > { %v568_v19 = vsel %vm566_vm5, %v561_v51, %v563_v17  ;;  %v569_v20 = vsel %vm566_vm5, %v563_v17, %v565_v12  ;;  %v664_v21 = vsel %vm662_vm4, %v657_v52, %v659_v18 }
 0x145   : > { %574 = vst [vmem:[#allocation3 + $0x8] sm:$0xf0] %v568_v19  ;;  %575 = vst [vmem:[#allocation3 + $0x10] sm:$0xf0] %v569_v20 }
 0x146   : > { %670 = vst [vmem:[#allocation3 + $0x38] sm:$0xf0] %v664_v21 }
 0x147   : > { %v611_v22 = vpop.permute.xlu1 %610  ;;  %v707_v23 = vpop.permute.xlu0 %706 }
 0x148   : > { %v616_v24 = vsel %vm614_vm8, %v609_v53, %v611_v22  ;;  %v617_v25 = vsel %vm614_vm8, %v611_v22, %v613_v15  ;;  %v712_v26 = vsel %vm710_vm7, %v705_v54, %v707_v23  ;;  %v751_v53 = vld [vmem:[#allocation3 + $0x30] sm:$0xff] }
 0x149   : > { %622 = vst [vmem:[#allocation3 + $0x20] sm:$0xf0] %v616_v24  ;;  %623 = vst [vmem:[#allocation3 + $0x28] sm:$0xf0] %v617_v25  ;;  %v1094_v54 = vpack.c.bf16 %v754_v47, %v751_v53 }
 0x14a   : > { %718 = vst [vmem:[#allocation3 + $0x50] sm:$0xf0] %v712_v26 }
 0x14b   : > { %v661_v27 = vpop.permute.xlu1 %660  ;;  %v589_v28 = vpop.permute.xlu0 %588 }
 0x14c   : > { %v665_v29 = vsel %vm662_vm4, %v659_v18, %v661_v27  ;;  %v593_v30 = vsel %vm590_vm3, %v587_v8, %v589_v28  ;;  %v746_v36 = vld [vmem:[#allocation3 + $0x8] sm:$0xff]  ;;  %v747_v50 = vld [vmem:[#allocation3 + $0x10] sm:$0xff] }
 0x14d   : > { %671 = vst [vmem:[#allocation3 + $0x40] sm:$0xf0] %v665_v29  ;;  %599 = vst [vmem:[#allocation3 + $0x28] sm:$0xf] %v593_v30  ;;  %v752_v42 = vld [vmem:[#allocation3 + $0x38] sm:$0xff] }
 0x14f   : > { %v709_v31 = vpop.permute.xlu1 %708  ;;  %v637_v32 = vpop.permute.xlu0 %636 }
 0x150   : > { %v713_v34 = vsel %vm710_vm7, %v707_v23, %v709_v31  ;;  %v641_v35 = vsel %vm638_vm1, %v635_v9, %v637_v32  ;;  %v749_v37 = vld [vmem:[#allocation3 + $0x20] sm:$0xff]  ;;  %vm956_vm1 = vcmask 917248  }
 0x151   : > { %v755_v38 = vld [vmem:[#allocation3 + $0x50] sm:$0xff]  ;;  %719 = vst [vmem:[#allocation3 + $0x58] sm:$0xf0] %v713_v34  ;;  %647 = vst [vmem:[#allocation3 + $0x40] sm:$0xf] %v641_v35  ;;  %v1088_v39 = vpack.c.bf16 %v749_v37, %v746_v36 }
 0x152   : > { %v1092_v45 = vpack.c.bf16 %v755_v38, %v752_v42 }
 0x153   : > { %v731_v43 = vpop.permute.xlu1 %730  ;;  %1089 = vmatprep.subr.bf16.mxu0 %v1088_v39  ;;  %v685_v44 = vpop.permute.xlu0 %684 }
 0x154   : > { %v736_v48 = vsel %vm734_vm9, %v729_v16, %v731_v43  ;;  %v689_v49 = vsel %vm686_vm2, %v683_v13, %v685_v44  ;;  %1091 = vmatpush1.bf16.msra.mxu0 %v1090_v41  ;;  %v750_v51 = vld [vmem:[#allocation3 + $0x28] sm:$0xff]  ;;  %vm961_vm2 = vcmask 1048448  }
 0x155   : > { %742 = vst [vmem:[#allocation3 + $0x68] sm:$0xf] %v736_v48  ;;  %695 = vst [vmem:[#allocation3 + $0x58] sm:$0xf] %v689_v49  ;;  %1093 = vmatprep.subr.bf16.mxu0 %v1092_v45  ;;  %v1097_v52 = vpack.c.bf16 %v750_v51, %v747_v50 }
 0x157   : > { %v733_v55 = vpop.permute.xlu1 %732  ;;  %1098 = vmatpush3.bf16.msra.mxu1 %v1097_v52  ;;  %v727_v56 = vpop.permute.xlu0 %726 }
 0x158   : > { %v737_v57 = vsel %vm734_vm9, %v731_v43, %v733_v55  ;;  %v735_v58 = vsel %vm734_vm9, %v727_v56, %v729_v16  ;;  %1095 = vmatpush1.bf16.msra.mxu0 %v1094_v54  ;;  %1099 = vmatprep.subr.bf16.mxu1 %v1189_v46  ;;  %v753_v60 = vld [vmem:[#allocation3 + $0x40] sm:$0xff] }
 0x159   : > { %743 = vst [vmem:[#allocation3 + $0x70] sm:$0xf] %v737_v57  ;;  %741 = vst [vmem:[#allocation3 + $0x60] sm:$0xf] %v735_v58 }
 0x15c   : > { %v758_v59 = vld [vmem:[#allocation3 + $0x68] sm:$0xf]  ;;  %v756_v61 = vld [vmem:[#allocation3 + $0x58] sm:$0xff] }
 0x15d   : > { %1060 = vmatprep.subr.msk.mxu0 %vm172_vm6, %v758_v59  ;;  %v1100_v62 = vpack.c.bf16 %v756_v61, %v753_v60 }
 0x15f   : > { %1101 = vmatpush3.bf16.msra.mxu1 %v1100_v62 }
 0x160   : > { %v757_v1 = vld [vmem:[#allocation3 + $0x60] sm:$0xf]  ;;  %1083 = vmatprep.subr.mxu1 %v1164_v0  ;;  %v759_v46 = vld [vmem:[#allocation3 + $0x70] sm:$0xf] }
 0x161   : > { %1061 = vmatpush1.msk.msra.mxu0 %vm172_vm6, %v757_v1 }
 0x162   : > { %1062 = vmatmul.mubr.msk.f32.vlgmr.msra.gmra.mrb[0].mxu0 %vm766_vm10, %v744_v63 }
 0x163   : > { %1084 = vmatpush3.msk.msra.mxu1 %vm172_vm6, %v759_v46  ;;  %vm926_vm6 = vcmask 261248  }
 0x164   : > { %1086 = vmatmul.mubr.msk.f32.vlgmr.msra.gmra.mrb[0].mxu1 %vm766_vm10, %v744_v63 }
 0x168   : > { %v764_v2 = vpop.permute.xlu0 %763 }
 0x235   : > { %v845_v3 = vpop.f32.mrb[0].mxu0 }
 0x236   : > { %v847_v4 = vpop.f32.mrb[1].mxu0  ;;  %v846_v5 = vadd.f32 %v845_v3, %v764_v2 }
 0x237   : > { %v916_v0 = vpop.f32.mrb[0].mxu1  ;;  %v848_v8 = vadd.f32 %v847_v4, %v764_v2 }
 0x238   : > { %v917_v6 = vadd.f32 %v916_v0, %v764_v2  ;;  %v1087_v7 = vpop.f32.mrb[1].mxu1  ;;  %921 = vst.msk [vmem:[%s1474_s24] sm:$0xff] %vm920_vm11, %v846_v5 }
 0x23a   : > { %984 = vrot.lane.b32.xlu1 %v917_v6, %s1192_s25  ;;  %976 = vrot.lane.b32.xlu0 %v917_v6, %s1193_s26 }
 0x23e   : > { %988 = vrot.lane.b32.xlu1 %v917_v6, %s1194_s13  ;;  %980 = vrot.lane.b32.xlu0 %v917_v6, %s1195_s27 }
 0x242   : > { %944 = vrot.lane.b32.xlu0 %v846_v5, %s1196_s28  ;;  %923 = vrot.lane.b32.xlu1 %v846_v5, %s1197_s29 }
 0x246   : > { %967 = vrot.lane.b32.xlu0 %v848_v8, %s1198_s30  ;;  %928 = vrot.lane.b32.xlu1 %v846_v5, %s1199_s4 }
 0x24a   : > { %971 = vrot.lane.b32.xlu0 %v848_v8, %s1200_s5  ;;  %933 = vrot.lane.b32.xlu1 %v846_v5, %s1184_s10 }
 0x24e   : > { %953 = vrot.lane.b32.xlu0 %v848_v8, %s1187_s15  ;;  %938 = vrot.lane.b32.xlu1 %v846_v5, %s1201_s6 }
 0x252   : > { %958 = vrot.lane.b32.xlu0 %v848_v8, %s1202_s7  ;;  %963 = vrot.lane.b32.xlu1 %v848_v8, %s1203_s8 }
 0x256   : > { %946 = vrot.lane.b32.xlu1 %v848_v8, %s1196_s28 }
 0x25a   : > { %992 = vrot.lane.b32.xlu1 %v917_v6, %s1204_s9 }
 0x2ac   : > { %v985_v9 = vpop.permute.xlu1 %984  ;;  %v977_v10 = vpop.permute.xlu0 %976 }
 0x2b0   : > { %v989_v11 = vpop.permute.xlu1 %988  ;;  %v981_v12 = vpop.permute.xlu0 %980 }
 0x2b4   : > { %v945_v13 = vpop.permute.xlu0 %944  ;;  %v924_v14 = vpop.permute.xlu1 %923 }
 0x2b5   : > { %927 = vst.msk [vmem:[%s1474_s24] sm:$0xff] %vm926_vm6, %v924_v14 }
 0x2b8   : > { %v929_v15 = vpop.permute.xlu1 %928  ;;  %v968_v16 = vpop.permute.xlu0 %967 }
 0x2b9   : > { %932 = vst.msk [vmem:[%s1474_s24] sm:$0xff] %vm931_vm12, %v929_v15 }
 0x2bc   : > { %v934_v17 = vpop.permute.xlu1 %933  ;;  %v972_v18 = vpop.permute.xlu0 %971 }
 0x2bd   : > { %937 = vst.msk [vmem:[%s1474_s24] sm:$0xff] %vm936_vm13, %v934_v17 }
 0x2c0   : > { %v939_v19 = vpop.permute.xlu1 %938  ;;  %v954_v21 = vpop.permute.xlu0 %953 }
 0x2c1   : > { %942 = vst.msk [vmem:[%s1474_s24] sm:$0xff] %vm941_vm14, %v939_v19 }
 0x2c4   : > { %v964_v20 = vpop.permute.xlu1 %963  ;;  %v959_v24 = vpop.permute.xlu0 %958 }
 0x2c5   : > { %966 = vst.msk [vmem:[%s1474_s24 + $0x8] sm:$0xff] %vm920_vm11, %v964_v20 }
 0x2c6   : > { %970 = vst.msk [vmem:[%s1474_s24 + $0x8] sm:$0xff] %vm926_vm6, %v968_v16 }
 0x2c7   : > { %974 = vst.msk [vmem:[%s1474_s24 + $0x8] sm:$0xff] %vm931_vm12, %v972_v18 }
 0x2c8   : > { %979 = vst.msk [vmem:[%s1474_s24 + $0x8] sm:$0xff] %vm936_vm13, %v977_v10  ;;  %v947_v22 = vpop.permute.xlu1 %946 }
 0x2c9   : > { %983 = vst.msk [vmem:[%s1474_s24 + $0x8] sm:$0xff] %vm941_vm14, %v981_v12  ;;  %v949_v23 = vsel %vm948_vm15, %v945_v13, %v947_v22 }
 0x2ca   : > { %952 = vst.msk [vmem:[%s1474_s24] sm:$0xff] %vm951_vm0, %v949_v23  ;;  %987 = vst.msk [vmem:[%s1474_s24 + $0x8] sm:$0xff] %vm951_vm0, %v985_v9 }
 0x2cb   : > { %957 = vst.msk [vmem:[%s1474_s24] sm:$0xff] %vm956_vm1, %v954_v21  ;;  %991 = vst.msk [vmem:[%s1474_s24 + $0x8] sm:$0xff] %vm956_vm1, %v989_v11 }
 0x2cc   : > { %v993_v25 = vpop.permute.xlu1 %992  ;;  %962 = vst.msk [vmem:[%s1474_s24] sm:$0xff] %vm961_vm2, %v959_v24 }
 0x2cd   : > { %995 = vst.msk [vmem:[%s1474_s24 + $0x8] sm:$0xff] %vm961_vm2, %v993_v25 }
 0x2ce PF: > { %s13_s12 = sadd.s32 1, %s1162_s12  }
 0x2cf   : > { %p10_p4 = scmp.ge.s32.totalorder %s13_s12, 4  }
 0x2d1   :  { %12 = sbr.rel (!%p10_p4) target bundleno = 1 (0x1), region = 62 }

</bundles_post_ra>
